<compile_context>
chip_gen: v5e
topology: v5e:2x2
jax: 0.10.0
libtpu: 0.0.40
codegen_flags: <defaults>
</compile_context>

<pallas_src>
import functools

import jax
import jax.numpy as jnp
from jax.experimental import pallas as pl
from jax.experimental.pallas import tpu as pltpu


_WORKSET_BUDGET = 10 * 1024 * 1024   # per-step pipelined working-set target
_FULL_EXTENT_HW = 512                # below this, one full-HW lane block is fine


# --------------------------------------------------------------------------
# Pass 1: partial spatial sums of sum_h(feats_h), accumulated in VMEM scratch.
# --------------------------------------------------------------------------
def _gap_kernel(*refs, height, hw, hw_tile, n_per_split):
    feat_refs = refs[:height]          # each (1, C, hw_tile)
    out_ref = refs[height]             # (1, 1, C, 1) partial-sum output block
    acc_ref = refs[height + 1]         # (1, C, lane_acc) f32 scratch

    p = pl.program_id(1)               # partial-split index
    s = pl.program_id(2)               # HW-tile index within the split

    @pl.when(s == 0)
    def _init():
        acc_ref[...] = jnp.zeros_like(acc_ref)

    c = feat_refs[0].shape[1]

    if hw_tile % 128 == 0:
        # Pure-VPU accumulation into 128 lanes; single XLU reduce at finalize.
        need_mask = (hw % hw_tile) != 0
        tile_start = (p * n_per_split + s) * hw_tile
        part = None
        for k in range(hw_tile // 128):
            sl = slice(k * 128, (k + 1) * 128)
            chunk = feat_refs[0][:, :, sl].astype(jnp.float32)
            for h in range(1, height):
                chunk = chunk + feat_refs[h][:, :, sl].astype(jnp.float32)
            if need_mask:
                lane = jax.lax.broadcasted_iota(jnp.int32, (1, c, 128), 2)
                chunk = jnp.where(tile_start + k * 128 + lane < hw, chunk, 0.0)
            part = chunk if part is None else part + chunk
        acc_ref[...] += part
    else:
        # Full-extent (small HW) block: hw_tile == hw, single step, no mask.
        tile = feat_refs[0][...].astype(jnp.float32)
        for h in range(1, height):
            tile = tile + feat_refs[h][...].astype(jnp.float32)
        acc_ref[...] += jnp.sum(tile, axis=-1, keepdims=True)

    @pl.when(s == pl.num_programs(2) - 1)
    def _finalize():
        # (1, C, lane_acc) -> (1, C, 1) -> (1, 1, C, 1); C stays on sublanes.
        out_ref[...] = jnp.sum(acc_ref[...], axis=-1, keepdims=True)[:, None]


# --------------------------------------------------------------------------
# Pass 2: out = sum_h feats_h * attn[:, :, h]   (attn is (B, C, height))
# --------------------------------------------------------------------------
def _wsum_kernel(*refs, height):
    attn_ref = refs[0]                 # (1, C, height)
    feat_refs = refs[1:1 + height]     # each (1, C, hw_tile)
    out_ref = refs[1 + height]         # (1, C, hw_tile)

    attn = attn_ref[...].astype(jnp.float32)                      # (1, C, height)
    acc = feat_refs[0][...].astype(jnp.float32) * attn[:, :, 0:1]
    for h in range(1, height):
        acc = acc + feat_refs[h][...].astype(jnp.float32) * attn[:, :, h:h + 1]
    out_ref[...] = acc.astype(out_ref.dtype)


# --------------------------------------------------------------------------
# VMEM-aware tile picking
# --------------------------------------------------------------------------
def _pick_hw_tile(hw, c, height, itemsize):
    def fits(tile):
        streamed = 2 * (height + 1) * c * tile * itemsize   # double-buffered blocks
        temps = 2 * c * tile * 4                            # live f32 temporaries
        return streamed + temps <= _WORKSET_BUDGET

    # Small spatial extent: one full-extent lane block (always legal, no tail).
    if hw <= _FULL_EXTENT_HW and fits(hw):
        return hw
    # Largest lane-dense multiple-of-128 tile that fits the working-set budget.
    for cand in (8192, 4096, 2048, 1024, 512, 256, 128):
        if cand <= hw and fits(cand):
            return cand
    # Degenerate fallback (tiny HW and/or enormous C).
    return 128 if hw >= 128 else hw


def _vmem_limit_bytes(c, hw_tile, height, itemsize):
    est = 2 * (height + 1) * c * hw_tile * itemsize + 4 * c * hw_tile * 4
    # Explicit limit covers the v5e 16 MiB scoped default; safe on v6e/v7x.
    return int(min(32 * 1024 * 1024, max(16 * 1024 * 1024, 2 * est)))


# --------------------------------------------------------------------------
# Wrapper
# --------------------------------------------------------------------------
def skfusion_pallas(in_feats, w1, w2, *, height):
    """in_feats: list of `height` arrays, each (B, C, H, W) (NCHW).

    w1: (d, C)          -- Conv2d(dim, d, 1, bias=False) squeezed to a matrix
    w2: (height*C, d)   -- Conv2d(d, dim*height, 1, bias=False) squeezed
    """
    assert len(in_feats) == height
    B, C, H, W = in_feats[0].shape
    HW = H * W
    dtype = in_feats[0].dtype
    itemsize = jnp.dtype(dtype).itemsize

    # Free reshape views (no stack / no extra HBM copy of the activations).
    feats3d = [x.reshape(B, C, HW) for x in in_feats]

    hw_tile = _pick_hw_tile(HW, C, height, itemsize)
    n_hw = pl.cdiv(HW, hw_tile)
    # Split pass-1's HW reduction into 2 parallel partials when it divides
    # cleanly, so v7x megacore has work at small/odd batch sizes.
    n_split = 2 if (n_hw % 2 == 0 and n_hw >= 2) else 1
    n_per_split = n_hw // n_split
    lane_acc = 128 if hw_tile % 128 == 0 else 1
    feat_bytes = B * C * HW * itemsize
    vmem_limit = _vmem_limit_bytes(C, hw_tile, height, itemsize)

    # ---------------- pass 1: partial GAP sums of sum_h feats_h --------------
    partials = pl.pallas_call(
        functools.partial(_gap_kernel, height=height, hw=HW,
                          hw_tile=hw_tile, n_per_split=n_per_split),
        out_shape=jax.ShapeDtypeStruct((B, n_split, C, 1), jnp.float32),
        grid=(B, n_split, n_per_split),
        in_specs=[pl.BlockSpec((1, C, hw_tile),
                               lambda b, p, s: (b, 0, p * n_per_split + s))
                  for _ in range(height)],
        out_specs=pl.BlockSpec((1, 1, C, 1), lambda b, p, s: (b, p, 0, 0)),
        scratch_shapes=[pltpu.VMEM((1, C, lane_acc), jnp.float32)],
        compiler_params=pltpu.CompilerParams(
            dimension_semantics=("parallel", "parallel", "arbitrary"),
            vmem_limit_bytes=vmem_limit),
        cost_estimate=pl.CostEstimate(
            flops=height * B * C * HW,
            transcendentals=0,
            bytes_accessed=height * feat_bytes + B * n_split * C * 4),
    )(*feats3d)

    gap = jnp.sum(partials[..., 0], axis=1) * (1.0 / HW)           # (B, C) f32

    # -------- tiny MLP (1x1 convs) + softmax over branches, in plain JAX ----
    hidden = jax.nn.relu(jnp.dot(gap, w1.T.astype(jnp.float32)))   # (B, d)
    logits = jnp.dot(hidden, w2.T.astype(jnp.float32))             # (B, height*C)
    attn = jax.nn.softmax(logits.reshape(B, height, C), axis=1)    # (B, height, C)
    attn_t = jnp.transpose(attn, (0, 2, 1)).astype(jnp.float32)    # (B, C, height)

    # ---------------- pass 2: streaming weighted branch sum ------------------
    out = pl.pallas_call(
        functools.partial(_wsum_kernel, height=height),
        out_shape=jax.ShapeDtypeStruct((B, C, HW), dtype),
        grid=(B, n_hw),
        in_specs=[pl.BlockSpec((1, C, height), lambda b, s: (b, 0, 0))]
                 + [pl.BlockSpec((1, C, hw_tile), lambda b, s: (b, 0, s))
                    for _ in range(height)],
        out_specs=pl.BlockSpec((1, C, hw_tile), lambda b, s: (b, 0, s)),
        compiler_params=pltpu.CompilerParams(
            dimension_semantics=("parallel", "parallel"),
            vmem_limit_bytes=vmem_limit),
        cost_estimate=pl.CostEstimate(
            flops=2 * height * B * C * HW,
            transcendentals=0,
            bytes_accessed=(height + 1) * feat_bytes + B * height * C * 4),
    )(attn_t, *feats3d)

    return out.reshape(B, C, H, W)


def skfusion_ref(in_feats, w1, w2, *, height):
    """Pure-JAX reference matching the PyTorch forward."""
    B, C, H, W = in_feats[0].shape
    feats = jnp.stack(in_feats, axis=1)                    # (B, height, C, H, W)
    feats_sum = jnp.sum(feats, axis=1)                     # (B, C, H, W)
    gap = jnp.mean(feats_sum, axis=(2, 3))                 # (B, C)
    hidden = jax.nn.relu(gap @ w1.T)                       # (B, d)
    attn = jax.nn.softmax((hidden @ w2.T).reshape(B, height, C), axis=1)
    return jnp.sum(feats * attn[:, :, :, None, None], axis=1)


if __name__ == "__main__":
    # Small shapes consistent with the module: dim=C=16, height=2, reduction=8
    B, C, H, W = 2, 16, 16, 16
    height = 2
    reduction = 8
    d = max(C // reduction, 4)

    key = jax.random.PRNGKey(0)
    k1, k2, k3, k4 = jax.random.split(key, 4)
    x0 = jax.random.normal(k1, (B, C, H, W), dtype=jnp.float32)
    x1 = jax.random.normal(k2, (B, C, H, W), dtype=jnp.float32)
    # Conv2d 1x1 weights (bias=False), squeezed to matrices.
    w1 = jax.random.normal(k3, (d, C), dtype=jnp.float32) * 0.1            # (d, C)
    w2 = jax.random.normal(k4, (height * C, d), dtype=jnp.float32) * 0.1   # (height*C, d)

    out = skfusion_pallas([x0, x1], w1, w2, height=height)
    out = jax.block_until_ready(out)

    ref = skfusion_ref([x0, x1], w1, w2, height=height)
    assert out.shape == (B, C, H, W)
    assert jnp.allclose(out, ref, atol=1e-5, rtol=1e-5), "mismatch vs reference"

    print("KERNEL_OK")
</pallas_src>

<mosaic_0001>
module attributes {stable_mosaic.version = 11 : i64} {
  func.func @_gap_kernel(%arg0: i32, %arg1: i32, %arg2: i32, %arg3: memref<1x16x256xf32, #tpu.memory_space<vmem>>, %arg4: memref<1x16x256xf32, #tpu.memory_space<vmem>>, %arg5: memref<1x1x16x1xf32, #tpu.memory_space<vmem>>, %arg6: memref<1x16x128xf32, #tpu.memory_space<vmem>>) attributes {dimension_semantics = [#tpu.dimension_semantics<parallel>, #tpu.dimension_semantics<parallel>, #tpu.dimension_semantics<arbitrary>], iteration_bounds = array<i64: 2, 1, 1>, scalar_prefetch = 0 : i64, scratch_operands = 1 : i64, tpu.core_type = #tpu.core_type<tc>, window_params = [{transform_indices = @transform_0, window_bounds = array<i64: 1, 16, 256>}, {transform_indices = @transform_1, window_bounds = array<i64: 1, 16, 256>}, {transform_indices = @transform_2, window_bounds = array<i64: 1, 1, 16, 1>}]} {
    %c0_i32 = arith.constant 0 : i32
    %0 = arith.cmpi eq, %arg2, %c0_i32 : i32
    %1 = arith.extui %0 : i1 to i32
    %c0_i32_0 = arith.constant 0 : i32
    %2 = arith.cmpi ne, %1, %c0_i32_0 : i32
    scf.if %2 {
      %cst = arith.constant 0.000000e+00 : f32
      %16 = vector.broadcast %cst : f32 to vector<1x16x128xf32>
      %c0_19 = arith.constant 0 : index
      %c0_20 = arith.constant 0 : index
      %c0_21 = arith.constant 0 : index
      %17 = vector.load %arg6[%c0_19, %c0_20, %c0_21] : memref<1x16x128xf32, #tpu.memory_space<vmem>>, vector<1x16x128xf32>
      tpu.vector_store %arg6[%c0_19, %c0_20, %c0_21], %16 {strides = array<i32>} : memref<1x16x128xf32, #tpu.memory_space<vmem>>, vector<1x16x128xf32>,
    } else {
    }
    %c0 = arith.constant 0 : index
    %c0_1 = arith.constant 0 : index
    %c0_2 = arith.constant 0 : index
    %3 = vector.load %arg3[%c0, %c0_1, %c0_2] : memref<1x16x256xf32, #tpu.memory_space<vmem>>, vector<1x16x128xf32>
    %c0_3 = arith.constant 0 : index
    %c0_4 = arith.constant 0 : index
    %c0_5 = arith.constant 0 : index
    %4 = vector.load %arg4[%c0_3, %c0_4, %c0_5] : memref<1x16x256xf32, #tpu.memory_space<vmem>>, vector<1x16x128xf32>
    %5 = arith.addf %3, %4 : vector<1x16x128xf32>
    %c0_6 = arith.constant 0 : index
    %c0_7 = arith.constant 0 : index
    %c128 = arith.constant 128 : index
    %6 = vector.load %arg3[%c0_6, %c0_7, %c128] : memref<1x16x256xf32, #tpu.memory_space<vmem>>, vector<1x16x128xf32>
    %c0_8 = arith.constant 0 : index
    %c0_9 = arith.constant 0 : index
    %c128_10 = arith.constant 128 : index
    %7 = vector.load %arg4[%c0_8, %c0_9, %c128_10] : memref<1x16x256xf32, #tpu.memory_space<vmem>>, vector<1x16x128xf32>
    %8 = arith.addf %6, %7 : vector<1x16x128xf32>
    %9 = arith.addf %5, %8 : vector<1x16x128xf32>
    %c0_11 = arith.constant 0 : index
    %c0_12 = arith.constant 0 : index
    %c0_13 = arith.constant 0 : index
    %10 = vector.load %arg6[%c0_11, %c0_12, %c0_13] : memref<1x16x128xf32, #tpu.memory_space<vmem>>, vector<1x16x128xf32>
    %11 = arith.addf %10, %9 : vector<1x16x128xf32>
    %c0_14 = arith.constant 0 : index
    %c0_15 = arith.constant 0 : index
    %c0_16 = arith.constant 0 : index
    %12 = vector.load %arg6[%c0_14, %c0_15, %c0_16] : memref<1x16x128xf32, #tpu.memory_space<vmem>>, vector<1x16x128xf32>
    tpu.vector_store %arg6[%c0_14, %c0_15, %c0_16], %11 {strides = array<i32>} : memref<1x16x128xf32, #tpu.memory_space<vmem>>, vector<1x16x128xf32>,
    %c0_i32_17 = arith.constant 0 : i32
    %13 = arith.cmpi eq, %arg2, %c0_i32_17 : i32
    %14 = arith.extui %13 : i1 to i32
    %c0_i32_18 = arith.constant 0 : i32
    %15 = arith.cmpi ne, %14, %c0_i32_18 : i32
    scf.if %15 {
      %c0_19 = arith.constant 0 : index
      %c0_20 = arith.constant 0 : index
      %c0_21 = arith.constant 0 : index
      %16 = vector.load %arg6[%c0_19, %c0_20, %c0_21] : memref<1x16x128xf32, #tpu.memory_space<vmem>>, vector<1x16x128xf32>
      %cst = arith.constant dense<0.000000e+00> : vector<1x16xf32>
      %17 = vector.multi_reduction <add>, %16, %cst [2] : vector<1x16x128xf32> to vector<1x16xf32>
      %18 = vector.shape_cast %17 : vector<1x16xf32> to vector<1x16x1xf32>
      %19 = vector.shape_cast %18 : vector<1x16x1xf32> to vector<1x1x16x1xf32>
      %c0_22 = arith.constant 0 : index
      %c0_23 = arith.constant 0 : index
      %c0_24 = arith.constant 0 : index
      %c0_25 = arith.constant 0 : index
      %20 = vector.load %arg5[%c0_22, %c0_23, %c0_24, %c0_25] : memref<1x1x16x1xf32, #tpu.memory_space<vmem>>, vector<1x1x16x1xf32>
      tpu.vector_store %arg5[%c0_22, %c0_23, %c0_24, %c0_25], %19 {strides = array<i32>} : memref<1x1x16x1xf32, #tpu.memory_space<vmem>>, vector<1x1x16x1xf32>,
    } else {
    }
    return
  }
  func.func @transform_0(%arg0: i32, %arg1: i32, %arg2: i32) -> (i32, i32, i32) {
    %c1_i32 = arith.constant 1 : i32
    %0 = arith.muli %arg1, %c1_i32 : i32
    %1 = arith.addi %0, %arg2 : i32
    %c0_i32 = arith.constant 0 : i32
    %c0_i32_0 = arith.constant 0 : i32
    return %arg0, %c0_i32, %1 : i32, i32, i32
  }
  func.func @transform_1(%arg0: i32, %arg1: i32, %arg2: i32) -> (i32, i32, i32) {
    %c1_i32 = arith.constant 1 : i32
    %0 = arith.muli %arg1, %c1_i32 : i32
    %1 = arith.addi %0, %arg2 : i32
    %c0_i32 = arith.constant 0 : i32
    %c0_i32_0 = arith.constant 0 : i32
    return %arg0, %c0_i32, %1 : i32, i32, i32
  }
  func.func @transform_2(%arg0: i32, %arg1: i32, %arg2: i32) -> (i32, i32, i32, i32) {
    %c0_i32 = arith.constant 0 : i32
    %c0_i32_0 = arith.constant 0 : i32
    %c0_i32_1 = arith.constant 0 : i32
    return %arg0, %arg1, %c0_i32, %c0_i32_0 : i32, i32, i32, i32
  }
}

</mosaic_0001>

<bundles_post_ra>
// kernel: tpu_custom_call.1
= control target key start
LH: loop header
LB: loop body
LE: loop exit
PB: predicated region body
PF: predicated region fallthrough
CT: control target
= control target key end

     0   :  { %7 = vsyncpa [#allocation4], 0  ;;  %s745_s0 = inlined_call_operand.hbm [shape: f32[2,16,256], index: 0, kind: input, shape index: {}]   ;;  %s746_s1 = inlined_call_operand.hbm [shape: f32[2,16,256], index: 1, kind: input, shape index: {}]   ;;  %s747_s2 = inlined_call_operand.vmem [shape: f32[2,1,16,1], index: 2, kind: output, shape index: {}]  }
   0x1   :  { %9 = vsyncpa [#allocation4 + $0x1], 0 }
   0x2   :  { %10 = vsyncpa [#allocation6], 0 }
   0x3   :  { %12 = vsyncpa [#allocation6 + $0x1], 0  ;;  %s637_s9 = smov 0   ;;  %s639_s10 = smov 0  }
   0x4   :  { %s641_s11 = smov 0   ;;  %s643_s12 = smov 0  }
   0x5   :  { %s645_s13 = smov 0   ;;  %s647_s14 = smov 0  }
   0x6 LB: > { %s422_s15 = sadd.s32 4294967295, %s618_s14   ;;  %s37_s16 = sadd.s32 1, %s614_s13  ;;  %s618_s14 = sphi %s647_s14, %s18_s14   ;;  %s614_s13 = sphi %s645_s13, %s755_s13   ;;  %s610_s12 = sphi %s643_s12, %s754_s12   ;;  %s606_s11 = sphi %s641_s11, %s753_s11   ;;  %s602_s10 = sphi %s639_s10, %s752_s10   ;;  %s598_s9 = sphi %s637_s9, %s751_s9  }
   0x7   : > { %p39_p0 = scmp.ge.s32.totalorder %s37_s16, 2  ;;  %s48_s17 = sadd.s32 1, %s606_s11 }
   0x8   : > { %p55_p1 = scmp.ne.s32.totalorder %s606_s11, %s602_s10  ;;  %p56_p2 = scmp.eq.s32.totalorder %s618_s14, 0 }
   0x9   : > { %s757_s16 = smov (%p39_p0, %s37_s16), 0  ;;  %p61_p4 = scmp.ne.s32.totalorder %s602_s10, %s598_s9 }
   0xa   : > { %p673_p3 = por %p56_p2, %p55_p1  ;;  %s43_s19 = ssub.s32 %s614_s13, %s757_s16 }
   0xb   : > { %p62_p5 = scmp.eq.s32.totalorder %s422_s15, 0  ;;  %p46_p6 = scmp.eq.s32.totalorder %s43_s19, 0 }
   0xc   : > { %p453_p8 = scmp.lt.s32.totalorder %s618_s14, 2  ;;  %s689_s22 = sand.u32 1, %s606_s11  }
   0xd   : > { %p680_p7 = por %p62_p5, %p61_p4  ;;  %s439_s23 = sshll.u32 %s614_s13, 5 }
   0xe   : > { %s686_s21 = scalar_select %p46_p6, %s606_s11, %s48_s17  }
   0xf   : > { %s426_s24 = sshll.u32 %s689_s22, 5  ;;  %s155_s27 = scalar_lea.hbm %s745_s0, %s439_s23 }
  0x10   : > { %s156_s28 = sshll.u32 %s155_s27, 4  ;;  %s147_s29 = scalar_lea.vmem [#allocation3], %s426_s24  ;;  %s157_s28 = int_to_ptr.hbm [resolvable:$true] %s156_s28 }
  0x11   : > { %s158_s30 = sshll.u32 %s147_s29, 4  ;;  %p698_p9 = pnand %p453_p8, %p673_p3  ;;  %s159_s30 = int_to_ptr.vmem [resolvable:$true] %s158_s30 }
  0x12   : > { %p432_p10 = scmp.ge.s32.totalorder %s618_s14, 1  ;;  %p191_p11 = scmp.lt.s32.totalorder %s618_s14, 3 }
  0x13   : > { %s144_s4 = scalar_lea.sflag [#allocation4], %s689_s22  ;;  %s620_s5 = smov 256  }
  0x14   : > { %s621_s6 = smov 16   ;;  %p192_p12 = pnand %p432_p10, %p191_p11 }
  0x15   : > { %449 = dma.hbm_to_vmem [thread:$0]  (!%p698_p9), %s157_s28, 512, %s159_s30, %s144_s4, %s620_s5, %s620_s5, %s621_s6  }
  0x16   : > { %s180_s9 = scalar_lea.hbm %s746_s1, %s439_s23  ;;  %s172_s17 = scalar_lea.vmem [#allocation5], %s426_s24 }
  0x17   : > { %s181_s15 = sshll.u32 %s180_s9, 4  ;;  %s183_s18 = sshll.u32 %s172_s17, 4  ;;  %s182_s15 = int_to_ptr.hbm [resolvable:$true] %s181_s15  ;;  %s184_s18 = int_to_ptr.vmem [resolvable:$true] %s183_s18 }
  0x18   : > { %s169_s19 = scalar_lea.sflag [#allocation6], %s689_s22  ;;  %195 = sbr.rel (%p192_p12) target bundleno = 163 (0xa3), region = 28 }
  0x19   : > { %452 = dma.hbm_to_vmem [thread:$0]  (!%p698_p9), %s182_s15, 512, %s184_s18, %s169_s19, %s620_s5, %s620_s5, %s621_s6  }
  0x1a   : > { %s197_s25 = sand.u32 (!%p192_p12), 1, %s602_s10  }
  0x1b   : > { %s433_s26 = sshll.u32 (!%p192_p12), %s197_s25, 5  ;;  %s198_s27 = scalar_lea.sflag (!%p192_p12), [#allocation4], %s197_s25 }
  0x1c   : > { %s201_s28 = scalar_lea.vmem (!%p192_p12), [#allocation3], %s433_s26 }
  0x1d   : > { %589 = dma.done.wait (%p680_p7), %s198_s27, 512  }
  0x1e   : > { %591 = vsyncadd (%p680_p7), %s198_s27, 4294966784  ;;  %s208_s23 = scalar_lea.sflag [#allocation6], %s197_s25  ;;  %s211_s24 = scalar_lea.vmem [#allocation5], %s433_s26 }
  0x1f   : > { %593 = dma.done.wait (%p680_p7), %s208_s23, 512  }
  0x20   : > { %595 = vsyncadd (%p680_p7), %s208_s23, 4294966784  ;;  %v261_v0 = vld [vmem:[%s201_s28] sm:$0xff]  ;;  %v267_v2 = vld [vmem:[%s201_s28 + $0x8] sm:$0xff]  ;;  %p246_p13 = scmp.lt.s32.totalorder %s610_s12, 1  ;;  %vm290_vm0 = vcmask 7168  }
  0x21   : > { %v263_v1 = vld [vmem:[%s211_s24] sm:$0xff]  ;;  %v269_v4 = vld [vmem:[%s211_s24 + $0x8] sm:$0xff]  ;;  %v262_v6 = vld [vmem:[%s201_s28 + $0x10] sm:$0xff] }
  0x22   : > { %v265_v3 = vadd.f32 %v263_v1, %v261_v0  ;;  %v271_v5 = vadd.f32 %v269_v4, %v267_v2  ;;  %v264_v7 = vld [vmem:[%s211_s24 + $0x10] sm:$0xff]  ;;  %v268_v8 = vld [vmem:[%s201_s28 + $0x18] sm:$0xff]  ;;  %s759_s12 = smov (!%p246_p13, %s610_s12), 1 }
  0x23   : > { %v270_v9 = vld [vmem:[%s211_s24 + $0x18] sm:$0xff]  ;;  %v266_v11 = vadd.f32 %v264_v7, %v262_v6  ;;  %s441_s20 = sshll.u32 %s759_s12, 4 }
  0x24   : > { %v273_v10 = vadd.f32 %v271_v5, %v265_v3  ;;  %v272_v12 = vadd.f32 %v270_v9, %v268_v8  ;;  %s254_s30 = scalar_lea.vmem %s747_s2, %s441_s20 }
  0x26   : > { %286 = vadd.xlane.f32.xlu0 %v273_v10  ;;  %v274_v13 = vadd.f32 %v272_v12, %v266_v11 }
  0x2e   : > { %288 = vadd.xlane.f32.xlu0 %v274_v13 }
  0x99   : > { %v287_v14 = vpop.xlane.xlu0 %286 }
  0x9a   : > { %291 = vst.msk [vmem:[%s254_s30] sm:$0xff] %vm290_vm0, %v287_v14 }
  0xa1   : > { %v289_v15 = vpop.xlane.xlu0 %288 }
  0xa2   : > { %292 = vst.msk [vmem:[%s254_s30 + $0x8] sm:$0xff] %vm290_vm0, %v289_v15 }
  0xa3 PF: > { %s18_s14 = sadd.s32 1, %s618_s14   ;;  %s751_s9 = smov %s602_s10 }
  0xa4   : > { %p15_p0 = scmp.ge.s32.totalorder %s18_s14, 4   ;;  %s752_s10 = smov %s606_s11 }
  0xa5   : > { %s753_s11 = smov %s686_s21  ;;  %s754_s12 = smov %s614_s13 }
  0xa6   : > { %s755_s13 = smov %s757_s16  ;;  %17 = sbr.rel (!%p15_p0) target bundleno = 6 (0x6), region = 89 }
  0xab   :  { %322 = vsyncpa [#allocation4], 1 }
  0xac   :  { %324 = vsyncpa [#allocation4 + $0x1], 1 }
  0xad   :  { %325 = vsyncpa [#allocation6], 1 }
  0xae   :  { %327 = vsyncpa [#allocation6 + $0x1], 1 }

</bundles_post_ra>
